<compile_context>
chip_gen: v6e
topology: v6e:2x2x1
jax: 0.10.0
libtpu: 0.0.40
codegen_flags: <defaults>
</compile_context>

<pallas_src>
import jax
import jax.numpy as jnp
from jax.experimental import pallas as pl
from jax.experimental.pallas import tpu as pltpu

# Small, TPU-friendly sizes: 4*H = 128 lanes exactly.
T, B, I, H = 8, 2, 16, 32
G = 4 * H  # 128


def lstm_kernel(x_ref, h0_ref, c0_ref, wihT_ref, whhT_ref, b_ref,
                y_ref, hn_ref, cn_ref, xg_scr):
    # ---- Hoisted input projection: one (T*B, I) x (I, 4H) matmul + bias ----
    xg_scr[...] = (
        jnp.dot(x_ref[...], wihT_ref[...], preferred_element_type=jnp.float32)
        + b_ref[...])

    # Lane-index masks over the 128-lane gate vector; PyTorch gate order [i, f, g, o].
    lane = jax.lax.broadcasted_iota(jnp.int32, (B, G), 1)
    g_mask = jnp.logical_and(lane >= 2 * H, lane < 3 * H)   # tanh lanes (g gate)
    r_mask = jnp.logical_and(lane >= H, lane < 2 * H)       # result lanes (f gate; h/c home)

    w_hh_T = whhT_ref[...]    # (4H, 4H); nonzero rows only at [H, 2H)
    h0 = h0_ref[...]          # (B, 4H); valid at lanes [H, 2H), zero elsewhere
    c0 = c0_ref[...]

    def step(t, carry):
        h, c = carry                                            # (B, 4H) vreg carries
        gates = xg_scr[pl.ds(t * B, B), :] + jnp.dot(
            h, w_hh_T, preferred_element_type=jnp.float32)      # (B, 4H)
        # Full-width nonlinearities (EUP handles all 128 lanes), tanh on the g lanes.
        act = jnp.where(g_mask, jnp.tanh(gates), jax.nn.sigmoid(gates))
        # Bring i (lanes [0,H)) and g (lanes [2H,3H)) onto the result lanes [H,2H);
        # the i*g product is invariant to the roll sign convention, and 2H == -2H mod 4H.
        a1 = pltpu.roll(act, H, axis=1)
        a2 = pltpu.roll(act, 3 * H, axis=1)
        o_r = pltpu.roll(act, 2 * H, axis=1)                    # o gate onto result lanes
        c_new = jnp.where(r_mask, act * c + a1 * a2, 0.0)       # f*c + i*g on result lanes
        h_new = jnp.where(r_mask, o_r * jnp.tanh(c_new), 0.0)
        y_ref[t] = h_new                                        # lane-dense (B, 128) store
        return h_new, c_new

    h_fin, c_fin = jax.lax.fori_loop(0, T, step, (h0, c0), unroll=True)
    hn_ref[...] = h_fin
    cn_ref[...] = c_fin


@jax.jit
def lstm_forward(x, h0, c0, w_ih, w_hh, b_ih, b_hh):
    """x: (T,B,I); h0,c0: (1,B,H); w_ih: (4H,I); w_hh: (4H,H); biases: (4H,)."""
    wihT = w_ih.T.astype(jnp.float32)                                     # (I, 4H)
    whhT_pad = jnp.zeros((G, G), jnp.float32).at[H:2 * H, :].set(w_hh.T)  # (4H, 4H)
    bias = (b_ih + b_hh).reshape(1, G).astype(jnp.float32)
    x2d = x.reshape(T * B, I)
    h0f = jnp.zeros((B, G), jnp.float32).at[:, H:2 * H].set(h0[0])
    c0f = jnp.zeros((B, G), jnp.float32).at[:, H:2 * H].set(c0[0])

    out_shapes = (
        jax.ShapeDtypeStruct((T, B, G), jnp.float32),   # all h_t, full gate width
        jax.ShapeDtypeStruct((B, G), jnp.float32),      # h_n, full gate width
        jax.ShapeDtypeStruct((B, G), jnp.float32),      # c_n, full gate width
    )
    y, hn, cn = pl.pallas_call(
        lstm_kernel,
        out_shape=out_shapes,
        in_specs=[pl.BlockSpec(memory_space=pltpu.MemorySpace.VMEM) for _ in range(6)],
        out_specs=tuple(pl.BlockSpec(memory_space=pltpu.MemorySpace.VMEM) for _ in range(3)),
        scratch_shapes=[pltpu.VMEM((T * B, G), jnp.float32)],   # hoisted input projection
    )(x2d, h0f, c0f, wihT, whhT_pad, bias)

    logits = y[:, :, H:2 * H]        # (T, B, H)
    h_n = hn[None, :, H:2 * H]       # (1, B, H)
    c_n = cn[None, :, H:2 * H]       # (1, B, H)
    return logits, h_n, c_n


def lstm_ref(x, h0, c0, w_ih, w_hh, b_ih, b_hh):
    """Pure-JAX reference (PyTorch nn.LSTM semantics, single layer)."""
    bias = b_ih + b_hh
    hi = jax.lax.Precision.HIGHEST

    def step(carry, x_t):
        h, c = carry
        gates = (jnp.dot(x_t, w_ih.T, precision=hi)
                 + jnp.dot(h, w_hh.T, precision=hi) + bias)
        i, f, g, o = jnp.split(gates, 4, axis=-1)
        i = jax.nn.sigmoid(i)
        f = jax.nn.sigmoid(f)
        g = jnp.tanh(g)
        o = jax.nn.sigmoid(o)
        c = f * c + i * g
        h = o * jnp.tanh(c)
        return (h, c), h

    (h_n, c_n), ys = jax.lax.scan(step, (h0[0], c0[0]), x)
    return ys, h_n[None], c_n[None]


if __name__ == "__main__":
    key = jax.random.PRNGKey(0)
    kx, kh, kc, k1, k2, k3, k4 = jax.random.split(key, 7)

    # Deterministic inputs
    x = jax.random.normal(kx, (T, B, I), dtype=jnp.float32)
    h0 = jax.random.normal(kh, (1, B, H), dtype=jnp.float32)
    c0 = jax.random.normal(kc, (1, B, H), dtype=jnp.float32)

    # Deterministic parameters, PyTorch-style init U(-1/sqrt(H), 1/sqrt(H))
    s = 1.0 / jnp.sqrt(jnp.float32(H))
    w_ih = jax.random.uniform(k1, (4 * H, I), jnp.float32, -s, s)
    w_hh = jax.random.uniform(k2, (4 * H, H), jnp.float32, -s, s)
    b_ih = jax.random.uniform(k3, (4 * H,), jnp.float32, -s, s)
    b_hh = jax.random.uniform(k4, (4 * H,), jnp.float32, -s, s)

    logits, h_n, c_n = lstm_forward(x, h0, c0, w_ih, w_hh, b_ih, b_hh)
    jax.block_until_ready((logits, h_n, c_n))

    # Sanity check against pure-JAX reference
    ref_y, ref_h, ref_c = lstm_ref(x, h0, c0, w_ih, w_hh, b_ih, b_hh)
    assert logits.shape == (T, B, H) and h_n.shape == (1, B, H) and c_n.shape == (1, B, H)
    assert jnp.allclose(logits, ref_y, atol=1e-5, rtol=1e-5)
    assert jnp.allclose(h_n, ref_h, atol=1e-5, rtol=1e-5)
    assert jnp.allclose(c_n, ref_c, atol=1e-5, rtol=1e-5)

    print("KERNEL_OK")
</pallas_src>

<mosaic_0001>
module attributes {stable_mosaic.version = 11 : i64} {
  func.func @lstm_kernel(%arg0: memref<16x16xf32, #tpu.memory_space<vmem>>, %arg1: memref<2x128xf32, #tpu.memory_space<vmem>>, %arg2: memref<2x128xf32, #tpu.memory_space<vmem>>, %arg3: memref<16x128xf32, #tpu.memory_space<vmem>>, %arg4: memref<128x128xf32, #tpu.memory_space<vmem>>, %arg5: memref<1x128xf32, #tpu.memory_space<vmem>>, %arg6: memref<8x2x128xf32, #tpu.memory_space<vmem>>, %arg7: memref<2x128xf32, #tpu.memory_space<vmem>>, %arg8: memref<2x128xf32, #tpu.memory_space<vmem>>, %arg9: memref<16x128xf32, #tpu.memory_space<vmem>>) attributes {dimension_semantics = [], scalar_prefetch = 0 : i64, scratch_operands = 1 : i64, tpu.core_type = #tpu.core_type<tc>} {
    %c0 = arith.constant 0 : index
    %c0_0 = arith.constant 0 : index
    %0 = vector.load %arg0[%c0, %c0_0] : memref<16x16xf32, #tpu.memory_space<vmem>>, vector<16x16xf32>
    %c0_1 = arith.constant 0 : index
    %c0_2 = arith.constant 0 : index
    %1 = vector.load %arg3[%c0_1, %c0_2] : memref<16x128xf32, #tpu.memory_space<vmem>>, vector<16x128xf32>
    %cst = arith.constant dense<0.000000e+00> : vector<16x128xf32>
    %2 = tpu.matmul %0, %1, %cst {dimension_numbers = #tpu.dot_dimension_numbers<[1], [0], [0], [1], [0, 0, 1, 1], [], []>} : vector<16x16xf32>, vector<16x128xf32>, vector<16x128xf32> -> vector<16x128xf32>
    %c0_3 = arith.constant 0 : index
    %c0_4 = arith.constant 0 : index
    %3 = vector.load %arg5[%c0_3, %c0_4] : memref<1x128xf32, #tpu.memory_space<vmem>>, vector<1x128xf32>
    %4 = vector.broadcast %3 : vector<1x128xf32> to vector<16x128xf32>
    %5 = arith.addf %2, %4 : vector<16x128xf32>
    %c0_5 = arith.constant 0 : index
    %c0_6 = arith.constant 0 : index
    %6 = vector.load %arg9[%c0_5, %c0_6] : memref<16x128xf32, #tpu.memory_space<vmem>>, vector<16x128xf32>
    tpu.vector_store %arg9[%c0_5, %c0_6], %5 {strides = array<i32>} : memref<16x128xf32, #tpu.memory_space<vmem>>, vector<16x128xf32>,
    %7 = tpu.iota {dimensions = array<i32: 1>} : vector<2x128xi32>
    %c64_i32 = arith.constant 64 : i32
    %8 = vector.broadcast %c64_i32 : i32 to vector<2x128xi32>
    %9 = arith.cmpi sge, %7, %8 : vector<2x128xi32>
    %c96_i32 = arith.constant 96 : i32
    %10 = vector.broadcast %c96_i32 : i32 to vector<2x128xi32>
    %11 = arith.cmpi slt, %7, %10 : vector<2x128xi32>
    %12 = arith.andi %9, %11 : vector<2x128xi1>
    %c32_i32 = arith.constant 32 : i32
    %13 = vector.broadcast %c32_i32 : i32 to vector<2x128xi32>
    %14 = arith.cmpi sge, %7, %13 : vector<2x128xi32>
    %c64_i32_7 = arith.constant 64 : i32
    %15 = vector.broadcast %c64_i32_7 : i32 to vector<2x128xi32>
    %16 = arith.cmpi slt, %7, %15 : vector<2x128xi32>
    %17 = arith.andi %14, %16 : vector<2x128xi1>
    %c0_8 = arith.constant 0 : index
    %c0_9 = arith.constant 0 : index
    %18 = vector.load %arg4[%c0_8, %c0_9] : memref<128x128xf32, #tpu.memory_space<vmem>>, vector<128x128xf32>
    %c0_10 = arith.constant 0 : index
    %c0_11 = arith.constant 0 : index
    %19 = vector.load %arg1[%c0_10, %c0_11] : memref<2x128xf32, #tpu.memory_space<vmem>>, vector<2x128xf32>
    %c0_12 = arith.constant 0 : index
    %c0_13 = arith.constant 0 : index
    %20 = vector.load %arg2[%c0_12, %c0_13] : memref<2x128xf32, #tpu.memory_space<vmem>>, vector<2x128xf32>
    %c0_i32 = arith.constant 0 : i32
    %c2_i32 = arith.constant 2 : i32
    %21 = arith.muli %c0_i32, %c2_i32 : i32
    %22 = arith.index_cast %21 : i32 to index
    %c0_14 = arith.constant 0 : index
    %23 = vector.load %arg9[%22, %c0_14] : memref<16x128xf32, #tpu.memory_space<vmem>>, vector<2x128xf32>
    %cst_15 = arith.constant dense<0.000000e+00> : vector<2x128xf32>
    %24 = tpu.matmul %19, %18, %cst_15 {dimension_numbers = #tpu.dot_dimension_numbers<[1], [0], [0], [1], [0, 0, 1, 1], [], []>} : vector<2x128xf32>, vector<128x128xf32>, vector<2x128xf32> -> vector<2x128xf32>
    %25 = arith.addf %23, %24 : vector<2x128xf32>
    %26 = math.tanh %25 : vector<2x128xf32>
    %27 = arith.negf %25 : vector<2x128xf32>
    %28 = math.exp %27 : vector<2x128xf32>
    %cst_16 = arith.constant 1.000000e+00 : f32
    %29 = vector.broadcast %cst_16 : f32 to vector<2x128xf32>
    %30 = arith.addf %29, %28 : vector<2x128xf32>
    %31 = arith.divf %29, %30 : vector<2x128xf32>
    %32 = arith.select %12, %26, %31 : vector<2x128xi1>, vector<2x128xf32>
    %c32_i32_17 = arith.constant 32 : i32
    %33 = tpu.dynamic_rotate %32 by %c32_i32_17 dim 1 : vector<2x128xf32>, i32 -> vector<2x128xf32>
    %c96_i32_18 = arith.constant 96 : i32
    %34 = tpu.dynamic_rotate %32 by %c96_i32_18 dim 1 : vector<2x128xf32>, i32 -> vector<2x128xf32>
    %c64_i32_19 = arith.constant 64 : i32
    %35 = tpu.dynamic_rotate %32 by %c64_i32_19 dim 1 : vector<2x128xf32>, i32 -> vector<2x128xf32>
    %36 = arith.mulf %32, %20 : vector<2x128xf32>
    %37 = arith.mulf %33, %34 : vector<2x128xf32>
    %38 = arith.addf %36, %37 : vector<2x128xf32>
    %cst_20 = arith.constant 0.000000e+00 : f32
    %39 = vector.broadcast %cst_20 : f32 to vector<2x128xf32>
    %40 = arith.select %17, %38, %39 : vector<2x128xi1>, vector<2x128xf32>
    %41 = math.tanh %40 : vector<2x128xf32>
    %42 = arith.mulf %35, %41 : vector<2x128xf32>
    %cst_21 = arith.constant 0.000000e+00 : f32
    %43 = vector.broadcast %cst_21 : f32 to vector<2x128xf32>
    %44 = arith.select %17, %42, %43 : vector<2x128xi1>, vector<2x128xf32>
    %45 = arith.index_cast %c0_i32 : i32 to index
    %c0_22 = arith.constant 0 : index
    %c0_23 = arith.constant 0 : index
    %46 = vector.load %arg6[%45, %c0_22, %c0_23] : memref<8x2x128xf32, #tpu.memory_space<vmem>>, vector<1x2x128xf32>
    %47 = vector.shape_cast %46 : vector<1x2x128xf32> to vector<2x128xf32>
    %48 = vector.shape_cast %44 : vector<2x128xf32> to vector<1x2x128xf32>
    tpu.vector_store %arg6[%45, %c0_22, %c0_23], %48 {strides = array<i32>} : memref<8x2x128xf32, #tpu.memory_space<vmem>>, vector<1x2x128xf32>,
    %c1_i32 = arith.constant 1 : i32
    %c2_i32_24 = arith.constant 2 : i32
    %49 = arith.muli %c1_i32, %c2_i32_24 : i32
    %50 = arith.index_cast %49 : i32 to index
    %c0_25 = arith.constant 0 : index
    %51 = vector.load %arg9[%50, %c0_25] : memref<16x128xf32, #tpu.memory_space<vmem>>, vector<2x128xf32>
    %cst_26 = arith.constant dense<0.000000e+00> : vector<2x128xf32>
    %52 = tpu.matmul %44, %18, %cst_26 {dimension_numbers = #tpu.dot_dimension_numbers<[1], [0], [0], [1], [0, 0, 1, 1], [], []>} : vector<2x128xf32>, vector<128x128xf32>, vector<2x128xf32> -> vector<2x128xf32>
    %53 = arith.addf %51, %52 : vector<2x128xf32>
    %54 = math.tanh %53 : vector<2x128xf32>
    %55 = arith.negf %53 : vector<2x128xf32>
    %56 = math.exp %55 : vector<2x128xf32>
    %cst_27 = arith.constant 1.000000e+00 : f32
    %57 = vector.broadcast %cst_27 : f32 to vector<2x128xf32>
    %58 = arith.addf %57, %56 : vector<2x128xf32>
    %59 = arith.divf %57, %58 : vector<2x128xf32>
    %60 = arith.select %12, %54, %59 : vector<2x128xi1>, vector<2x128xf32>
    %c32_i32_28 = arith.constant 32 : i32
    %61 = tpu.dynamic_rotate %60 by %c32_i32_28 dim 1 : vector<2x128xf32>, i32 -> vector<2x128xf32>
    %c96_i32_29 = arith.constant 96 : i32
    %62 = tpu.dynamic_rotate %60 by %c96_i32_29 dim 1 : vector<2x128xf32>, i32 -> vector<2x128xf32>
    %c64_i32_30 = arith.constant 64 : i32
    %63 = tpu.dynamic_rotate %60 by %c64_i32_30 dim 1 : vector<2x128xf32>, i32 -> vector<2x128xf32>
    %64 = arith.mulf %60, %40 : vector<2x128xf32>
    %65 = arith.mulf %61, %62 : vector<2x128xf32>
    %66 = arith.addf %64, %65 : vector<2x128xf32>
    %cst_31 = arith.constant 0.000000e+00 : f32
    %67 = vector.broadcast %cst_31 : f32 to vector<2x128xf32>
    %68 = arith.select %17, %66, %67 : vector<2x128xi1>, vector<2x128xf32>
    %69 = math.tanh %68 : vector<2x128xf32>
    %70 = arith.mulf %63, %69 : vector<2x128xf32>
    %cst_32 = arith.constant 0.000000e+00 : f32
    %71 = vector.broadcast %cst_32 : f32 to vector<2x128xf32>
    %72 = arith.select %17, %70, %71 : vector<2x128xi1>, vector<2x128xf32>
    %73 = arith.index_cast %c1_i32 : i32 to index
    %c0_33 = arith.constant 0 : index
    %c0_34 = arith.constant 0 : index
    %74 = vector.load %arg6[%73, %c0_33, %c0_34] : memref<8x2x128xf32, #tpu.memory_space<vmem>>, vector<1x2x128xf32>
    %75 = vector.shape_cast %74 : vector<1x2x128xf32> to vector<2x128xf32>
    %76 = vector.shape_cast %72 : vector<2x128xf32> to vector<1x2x128xf32>
    tpu.vector_store %arg6[%73, %c0_33, %c0_34], %76 {strides = array<i32>} : memref<8x2x128xf32, #tpu.memory_space<vmem>>, vector<1x2x128xf32>,
    %c2_i32_35 = arith.constant 2 : i32
    %c2_i32_36 = arith.constant 2 : i32
    %77 = arith.muli %c2_i32_35, %c2_i32_36 : i32
    %78 = arith.index_cast %77 : i32 to index
    %c0_37 = arith.constant 0 : index
    %79 = vector.load %arg9[%78, %c0_37] : memref<16x128xf32, #tpu.memory_space<vmem>>, vector<2x128xf32>
    %cst_38 = arith.constant dense<0.000000e+00> : vector<2x128xf32>
    %80 = tpu.matmul %72, %18, %cst_38 {dimension_numbers = #tpu.dot_dimension_numbers<[1], [0], [0], [1], [0, 0, 1, 1], [], []>} : vector<2x128xf32>, vector<128x128xf32>, vector<2x128xf32> -> vector<2x128xf32>
    %81 = arith.addf %79, %80 : vector<2x128xf32>
    %82 = math.tanh %81 : vector<2x128xf32>
    %83 = arith.negf %81 : vector<2x128xf32>
    %84 = math.exp %83 : vector<2x128xf32>
    %cst_39 = arith.constant 1.000000e+00 : f32
    %85 = vector.broadcast %cst_39 : f32 to vector<2x128xf32>
    %86 = arith.addf %85, %84 : vector<2x128xf32>
    %87 = arith.divf %85, %86 : vector<2x128xf32>
    %88 = arith.select %12, %82, %87 : vector<2x128xi1>, vector<2x128xf32>
    %c32_i32_40 = arith.constant 32 : i32
    %89 = tpu.dynamic_rotate %88 by %c32_i32_40 dim 1 : vector<2x128xf32>, i32 -> vector<2x128xf32>
    %c96_i32_41 = arith.constant 96 : i32
    %90 = tpu.dynamic_rotate %88 by %c96_i32_41 dim 1 : vector<2x128xf32>, i32 -> vector<2x128xf32>
    %c64_i32_42 = arith.constant 64 : i32
    %91 = tpu.dynamic_rotate %88 by %c64_i32_42 dim 1 : vector<2x128xf32>, i32 -> vector<2x128xf32>
    %92 = arith.mulf %88, %68 : vector<2x128xf32>
    %93 = arith.mulf %89, %90 : vector<2x128xf32>
    %94 = arith.addf %92, %93 : vector<2x128xf32>
    %cst_43 = arith.constant 0.000000e+00 : f32
    %95 = vector.broadcast %cst_43 : f32 to vector<2x128xf32>
    %96 = arith.select %17, %94, %95 : vector<2x128xi1>, vector<2x128xf32>
    %97 = math.tanh %96 : vector<2x128xf32>
    %98 = arith.mulf %91, %97 : vector<2x128xf32>
    %cst_44 = arith.constant 0.000000e+00 : f32
    %99 = vector.broadcast %cst_44 : f32 to vector<2x128xf32>
    %100 = arith.select %17, %98, %99 : vector<2x128xi1>, vector<2x128xf32>
    %101 = arith.index_cast %c2_i32_35 : i32 to index
    %c0_45 = arith.constant 0 : index
    %c0_46 = arith.constant 0 : index
    %102 = vector.load %arg6[%101, %c0_45, %c0_46] : memref<8x2x128xf32, #tpu.memory_space<vmem>>, vector<1x2x128xf32>
    %103 = vector.shape_cast %102 : vector<1x2x128xf32> to vector<2x128xf32>
    %104 = vector.shape_cast %100 : vector<2x128xf32> to vector<1x2x128xf32>
    tpu.vector_store %arg6[%101, %c0_45, %c0_46], %104 {strides = array<i32>} : memref<8x2x128xf32, #tpu.memory_space<vmem>>, vector<1x2x128xf32>,
    %c3_i32 = arith.constant 3 : i32
    %c2_i32_47 = arith.constant 2 : i32
    %105 = arith.muli %c3_i32, %c2_i32_47 : i32
    %106 = arith.index_cast %105 : i32 to index
    %c0_48 = arith.constant 0 : index
    %107 = vector.load %arg9[%106, %c0_48] : memref<16x128xf32, #tpu.memory_space<vmem>>, vector<2x128xf32>
    %cst_49 = arith.constant dense<0.000000e+00> : vector<2x128xf32>
    %108 = tpu.matmul %100, %18, %cst_49 {dimension_numbers = #tpu.dot_dimension_numbers<[1], [0], [0], [1], [0, 0, 1, 1], [], []>} : vector<2x128xf32>, vector<128x128xf32>, vector<2x128xf32> -> vector<2x128xf32>
    %109 = arith.addf %107, %108 : vector<2x128xf32>
    %110 = math.tanh %109 : vector<2x128xf32>
    %111 = arith.negf %109 : vector<2x128xf32>
    %112 = math.exp %111 : vector<2x128xf32>
    %cst_50 = arith.constant 1.000000e+00 : f32
    %113 = vector.broadcast %cst_50 : f32 to vector<2x128xf32>
    %114 = arith.addf %113, %112 : vector<2x128xf32>
    %115 = arith.divf %113, %114 : vector<2x128xf32>
    %116 = arith.select %12, %110, %115 : vector<2x128xi1>, vector<2x128xf32>
    %c32_i32_51 = arith.constant 32 : i32
    %117 = tpu.dynamic_rotate %116 by %c32_i32_51 dim 1 : vector<2x128xf32>, i32 -> vector<2x128xf32>
    %c96_i32_52 = arith.constant 96 : i32
    %118 = tpu.dynamic_rotate %116 by %c96_i32_52 dim 1 : vector<2x128xf32>, i32 -> vector<2x128xf32>
    %c64_i32_53 = arith.constant 64 : i32
    %119 = tpu.dynamic_rotate %116 by %c64_i32_53 dim 1 : vector<2x128xf32>, i32 -> vector<2x128xf32>
    %120 = arith.mulf %116, %96 : vector<2x128xf32>
    %121 = arith.mulf %117, %118 : vector<2x128xf32>
    %122 = arith.addf %120, %121 : vector<2x128xf32>
    %cst_54 = arith.constant 0.000000e+00 : f32
    %123 = vector.broadcast %cst_54 : f32 to vector<2x128xf32>
    %124 = arith.select %17, %122, %123 : vector<2x128xi1>, vector<2x128xf32>
    %125 = math.tanh %124 : vector<2x128xf32>
    %126 = arith.mulf %119, %125 : vector<2x128xf32>
    %cst_55 = arith.constant 0.000000e+00 : f32
    %127 = vector.broadcast %cst_55 : f32 to vector<2x128xf32>
    %128 = arith.select %17, %126, %127 : vector<2x128xi1>, vector<2x128xf32>
    %129 = arith.index_cast %c3_i32 : i32 to index
    %c0_56 = arith.constant 0 : index
    %c0_57 = arith.constant 0 : index
    %130 = vector.load %arg6[%129, %c0_56, %c0_57] : memref<8x2x128xf32, #tpu.memory_space<vmem>>, vector<1x2x128xf32>
    %131 = vector.shape_cast %130 : vector<1x2x128xf32> to vector<2x128xf32>
    %132 = vector.shape_cast %128 : vector<2x128xf32> to vector<1x2x128xf32>
    tpu.vector_store %arg6[%129, %c0_56, %c0_57], %132 {strides = array<i32>} : memref<8x2x128xf32, #tpu.memory_space<vmem>>, vector<1x2x128xf32>,
    %c4_i32 = arith.constant 4 : i32
    %c2_i32_58 = arith.constant 2 : i32
    %133 = arith.muli %c4_i32, %c2_i32_58 : i32
    %134 = arith.index_cast %133 : i32 to index
    %c0_59 = arith.constant 0 : index
    %135 = vector.load %arg9[%134, %c0_59] : memref<16x128xf32, #tpu.memory_space<vmem>>, vector<2x128xf32>
    %cst_60 = arith.constant dense<0.000000e+00> : vector<2x128xf32>
    %136 = tpu.matmul %128, %18, %cst_60 {dimension_numbers = #tpu.dot_dimension_numbers<[1], [0], [0], [1], [0, 0, 1, 1], [], []>} : vector<2x128xf32>, vector<128x128xf32>, vector<2x128xf32> -> vector<2x128xf32>
    %137 = arith.addf %135, %136 : vector<2x128xf32>
    %138 = math.tanh %137 : vector<2x128xf32>
    %139 = arith.negf %137 : vector<2x128xf32>
    %140 = math.exp %139 : vector<2x128xf32>
    %cst_61 = arith.constant 1.000000e+00 : f32
    %141 = vector.broadcast %cst_61 : f32 to vector<2x128xf32>
    %142 = arith.addf %141, %140 : vector<2x128xf32>
    %143 = arith.divf %141, %142 : vector<2x128xf32>
    %144 = arith.select %12, %138, %143 : vector<2x128xi1>, vector<2x128xf32>
    %c32_i32_62 = arith.constant 32 : i32
    %145 = tpu.dynamic_rotate %144 by %c32_i32_62 dim 1 : vector<2x128xf32>, i32 -> vector<2x128xf32>
    %c96_i32_63 = arith.constant 96 : i32
    %146 = tpu.dynamic_rotate %144 by %c96_i32_63 dim 1 : vector<2x128xf32>, i32 -> vector<2x128xf32>
    %c64_i32_64 = arith.constant 64 : i32
    %147 = tpu.dynamic_rotate %144 by %c64_i32_64 dim 1 : vector<2x128xf32>, i32 -> vector<2x128xf32>
    %148 = arith.mulf %144, %124 : vector<2x128xf32>
    %149 = arith.mulf %145, %146 : vector<2x128xf32>
    %150 = arith.addf %148, %149 : vector<2x128xf32>
    %cst_65 = arith.constant 0.000000e+00 : f32
    %151 = vector.broadcast %cst_65 : f32 to vector<2x128xf32>
    %152 = arith.select %17, %150, %151 : vector<2x128xi1>, vector<2x128xf32>
    %153 = math.tanh %152 : vector<2x128xf32>
    %154 = arith.mulf %147, %153 : vector<2x128xf32>
    %cst_66 = arith.constant 0.000000e+00 : f32
    %155 = vector.broadcast %cst_66 : f32 to vector<2x128xf32>
    %156 = arith.select %17, %154, %155 : vector<2x128xi1>, vector<2x128xf32>
    %157 = arith.index_cast %c4_i32 : i32 to index
    %c0_67 = arith.constant 0 : index
    %c0_68 = arith.constant 0 : index
    %158 = vector.load %arg6[%157, %c0_67, %c0_68] : memref<8x2x128xf32, #tpu.memory_space<vmem>>, vector<1x2x128xf32>
    %159 = vector.shape_cast %158 : vector<1x2x128xf32> to vector<2x128xf32>
    %160 = vector.shape_cast %156 : vector<2x128xf32> to vector<1x2x128xf32>
    tpu.vector_store %arg6[%157, %c0_67, %c0_68], %160 {strides = array<i32>} : memref<8x2x128xf32, #tpu.memory_space<vmem>>, vector<1x2x128xf32>,
    %c5_i32 = arith.constant 5 : i32
    %c2_i32_69 = arith.constant 2 : i32
    %161 = arith.muli %c5_i32, %c2_i32_69 : i32
    %162 = arith.index_cast %161 : i32 to index
    %c0_70 = arith.constant 0 : index
    %163 = vector.load %arg9[%162, %c0_70] : memref<16x128xf32, #tpu.memory_space<vmem>>, vector<2x128xf32>
    %cst_71 = arith.constant dense<0.000000e+00> : vector<2x128xf32>
    %164 = tpu.matmul %156, %18, %cst_71 {dimension_numbers = #tpu.dot_dimension_numbers<[1], [0], [0], [1], [0, 0, 1, 1], [], []>} : vector<2x128xf32>, vector<128x128xf32>, vector<2x128xf32> -> vector<2x128xf32>
    %165 = arith.addf %163, %164 : vector<2x128xf32>
    %166 = math.tanh %165 : vector<2x128xf32>
    %167 = arith.negf %165 : vector<2x128xf32>
    %168 = math.exp %167 : vector<2x128xf32>
    %cst_72 = arith.constant 1.000000e+00 : f32
    %169 = vector.broadcast %cst_72 : f32 to vector<2x128xf32>
    %170 = arith.addf %169, %168 : vector<2x128xf32>
    %171 = arith.divf %169, %170 : vector<2x128xf32>
    %172 = arith.select %12, %166, %171 : vector<2x128xi1>, vector<2x128xf32>
    %c32_i32_73 = arith.constant 32 : i32
    %173 = tpu.dynamic_rotate %172 by %c32_i32_73 dim 1 : vector<2x128xf32>, i32 -> vector<2x128xf32>
    %c96_i32_74 = arith.constant 96 : i32
    %174 = tpu.dynamic_rotate %172 by %c96_i32_74 dim 1 : vector<2x128xf32>, i32 -> vector<2x128xf32>
    %c64_i32_75 = arith.constant 64 : i32
    %175 = tpu.dynamic_rotate %172 by %c64_i32_75 dim 1 : vector<2x128xf32>, i32 -> vector<2x128xf32>
    %176 = arith.mulf %172, %152 : vector<2x128xf32>
    %177 = arith.mulf %173, %174 : vector<2x128xf32>
    %178 = arith.addf %176, %177 : vector<2x128xf32>
    %cst_76 = arith.constant 0.000000e+00 : f32
    %179 = vector.broadcast %cst_76 : f32 to vector<2x128xf32>
    %180 = arith.select %17, %178, %179 : vector<2x128xi1>, vector<2x128xf32>
    %181 = math.tanh %180 : vector<2x128xf32>
    %182 = arith.mulf %175, %181 : vector<2x128xf32>
    %cst_77 = arith.constant 0.000000e+00 : f32
    %183 = vector.broadcast %cst_77 : f32 to vector<2x128xf32>
    %184 = arith.select %17, %182, %183 : vector<2x128xi1>, vector<2x128xf32>
    %185 = arith.index_cast %c5_i32 : i32 to index
    %c0_78 = arith.constant 0 : index
    %c0_79 = arith.constant 0 : index
    %186 = vector.load %arg6[%185, %c0_78, %c0_79] : memref<8x2x128xf32, #tpu.memory_space<vmem>>, vector<1x2x128xf32>
    %187 = vector.shape_cast %186 : vector<1x2x128xf32> to vector<2x128xf32>
    %188 = vector.shape_cast %184 : vector<2x128xf32> to vector<1x2x128xf32>
    tpu.vector_store %arg6[%185, %c0_78, %c0_79], %188 {strides = array<i32>} : memref<8x2x128xf32, #tpu.memory_space<vmem>>, vector<1x2x128xf32>,
    %c6_i32 = arith.constant 6 : i32
    %c2_i32_80 = arith.constant 2 : i32
    %189 = arith.muli %c6_i32, %c2_i32_80 : i32
    %190 = arith.index_cast %189 : i32 to index
    %c0_81 = arith.constant 0 : index
    %191 = vector.load %arg9[%190, %c0_81] : memref<16x128xf32, #tpu.memory_space<vmem>>, vector<2x128xf32>
    %cst_82 = arith.constant dense<0.000000e+00> : vector<2x128xf32>
    %192 = tpu.matmul %184, %18, %cst_82 {dimension_numbers = #tpu.dot_dimension_numbers<[1], [0], [0], [1], [0, 0, 1, 1], [], []>} : vector<2x128xf32>, vector<128x128xf32>, vector<2x128xf32> -> vector<2x128xf32>
    %193 = arith.addf %191, %192 : vector<2x128xf32>
    %194 = math.tanh %193 : vector<2x128xf32>
    %195 = arith.negf %193 : vector<2x128xf32>
    %196 = math.exp %195 : vector<2x128xf32>
    %cst_83 = arith.constant 1.000000e+00 : f32
    %197 = vector.broadcast %cst_83 : f32 to vector<2x128xf32>
    %198 = arith.addf %197, %196 : vector<2x128xf32>
    %199 = arith.divf %197, %198 : vector<2x128xf32>
    %200 = arith.select %12, %194, %199 : vector<2x128xi1>, vector<2x128xf32>
    %c32_i32_84 = arith.constant 32 : i32
    %201 = tpu.dynamic_rotate %200 by %c32_i32_84 dim 1 : vector<2x128xf32>, i32 -> vector<2x128xf32>
    %c96_i32_85 = arith.constant 96 : i32
    %202 = tpu.dynamic_rotate %200 by %c96_i32_85 dim 1 : vector<2x128xf32>, i32 -> vector<2x128xf32>
    %c64_i32_86 = arith.constant 64 : i32
    %203 = tpu.dynamic_rotate %200 by %c64_i32_86 dim 1 : vector<2x128xf32>, i32 -> vector<2x128xf32>
    %204 = arith.mulf %200, %180 : vector<2x128xf32>
    %205 = arith.mulf %201, %202 : vector<2x128xf32>
    %206 = arith.addf %204, %205 : vector<2x128xf32>
    %cst_87 = arith.constant 0.000000e+00 : f32
    %207 = vector.broadcast %cst_87 : f32 to vector<2x128xf32>
    %208 = arith.select %17, %206, %207 : vector<2x128xi1>, vector<2x128xf32>
    %209 = math.tanh %208 : vector<2x128xf32>
    %210 = arith.mulf %203, %209 : vector<2x128xf32>
    %cst_88 = arith.constant 0.000000e+00 : f32
    %211 = vector.broadcast %cst_88 : f32 to vector<2x128xf32>
    %212 = arith.select %17, %210, %211 : vector<2x128xi1>, vector<2x128xf32>
    %213 = arith.index_cast %c6_i32 : i32 to index
    %c0_89 = arith.constant 0 : index
    %c0_90 = arith.constant 0 : index
    %214 = vector.load %arg6[%213, %c0_89, %c0_90] : memref<8x2x128xf32, #tpu.memory_space<vmem>>, vector<1x2x128xf32>
    %215 = vector.shape_cast %214 : vector<1x2x128xf32> to vector<2x128xf32>
    %216 = vector.shape_cast %212 : vector<2x128xf32> to vector<1x2x128xf32>
    tpu.vector_store %arg6[%213, %c0_89, %c0_90], %216 {strides = array<i32>} : memref<8x2x128xf32, #tpu.memory_space<vmem>>, vector<1x2x128xf32>,
    %c7_i32 = arith.constant 7 : i32
    %c2_i32_91 = arith.constant 2 : i32
    %217 = arith.muli %c7_i32, %c2_i32_91 : i32
    %218 = arith.index_cast %217 : i32 to index
    %c0_92 = arith.constant 0 : index
    %219 = vector.load %arg9[%218, %c0_92] : memref<16x128xf32, #tpu.memory_space<vmem>>, vector<2x128xf32>
    %cst_93 = arith.constant dense<0.000000e+00> : vector<2x128xf32>
    %220 = tpu.matmul %212, %18, %cst_93 {dimension_numbers = #tpu.dot_dimension_numbers<[1], [0], [0], [1], [0, 0, 1, 1], [], []>} : vector<2x128xf32>, vector<128x128xf32>, vector<2x128xf32> -> vector<2x128xf32>
    %221 = arith.addf %219, %220 : vector<2x128xf32>
    %222 = math.tanh %221 : vector<2x128xf32>
    %223 = arith.negf %221 : vector<2x128xf32>
    %224 = math.exp %223 : vector<2x128xf32>
    %cst_94 = arith.constant 1.000000e+00 : f32
    %225 = vector.broadcast %cst_94 : f32 to vector<2x128xf32>
    %226 = arith.addf %225, %224 : vector<2x128xf32>
    %227 = arith.divf %225, %226 : vector<2x128xf32>
    %228 = arith.select %12, %222, %227 : vector<2x128xi1>, vector<2x128xf32>
    %c32_i32_95 = arith.constant 32 : i32
    %229 = tpu.dynamic_rotate %228 by %c32_i32_95 dim 1 : vector<2x128xf32>, i32 -> vector<2x128xf32>
    %c96_i32_96 = arith.constant 96 : i32
    %230 = tpu.dynamic_rotate %228 by %c96_i32_96 dim 1 : vector<2x128xf32>, i32 -> vector<2x128xf32>
    %c64_i32_97 = arith.constant 64 : i32
    %231 = tpu.dynamic_rotate %228 by %c64_i32_97 dim 1 : vector<2x128xf32>, i32 -> vector<2x128xf32>
    %232 = arith.mulf %228, %208 : vector<2x128xf32>
    %233 = arith.mulf %229, %230 : vector<2x128xf32>
    %234 = arith.addf %232, %233 : vector<2x128xf32>
    %cst_98 = arith.constant 0.000000e+00 : f32
    %235 = vector.broadcast %cst_98 : f32 to vector<2x128xf32>
    %236 = arith.select %17, %234, %235 : vector<2x128xi1>, vector<2x128xf32>
    %237 = math.tanh %236 : vector<2x128xf32>
    %238 = arith.mulf %231, %237 : vector<2x128xf32>
    %cst_99 = arith.constant 0.000000e+00 : f32
    %239 = vector.broadcast %cst_99 : f32 to vector<2x128xf32>
    %240 = arith.select %17, %238, %239 : vector<2x128xi1>, vector<2x128xf32>
    %241 = arith.index_cast %c7_i32 : i32 to index
    %c0_100 = arith.constant 0 : index
    %c0_101 = arith.constant 0 : index
    %242 = vector.load %arg6[%241, %c0_100, %c0_101] : memref<8x2x128xf32, #tpu.memory_space<vmem>>, vector<1x2x128xf32>
    %243 = vector.shape_cast %242 : vector<1x2x128xf32> to vector<2x128xf32>
    %244 = vector.shape_cast %240 : vector<2x128xf32> to vector<1x2x128xf32>
    tpu.vector_store %arg6[%241, %c0_100, %c0_101], %244 {strides = array<i32>} : memref<8x2x128xf32, #tpu.memory_space<vmem>>, vector<1x2x128xf32>,
    %c8_i32 = arith.constant 8 : i32
    %c0_102 = arith.constant 0 : index
    %c0_103 = arith.constant 0 : index
    %245 = vector.load %arg7[%c0_102, %c0_103] : memref<2x128xf32, #tpu.memory_space<vmem>>, vector<2x128xf32>
    tpu.vector_store %arg7[%c0_102, %c0_103], %240 {strides = array<i32>} : memref<2x128xf32, #tpu.memory_space<vmem>>, vector<2x128xf32>,
    %c0_104 = arith.constant 0 : index
    %c0_105 = arith.constant 0 : index
    %246 = vector.load %arg8[%c0_104, %c0_105] : memref<2x128xf32, #tpu.memory_space<vmem>>, vector<2x128xf32>
    tpu.vector_store %arg8[%c0_104, %c0_105], %236 {strides = array<i32>} : memref<2x128xf32, #tpu.memory_space<vmem>>, vector<2x128xf32>,
    return
  }
}

</mosaic_0001>

<bundles_post_ra>
// kernel: lstm_forward.1
= control target key start
LH: loop header
LB: loop body
LE: loop exit
PB: predicated region body
PF: predicated region fallthrough
CT: control target
= control target key end

     0   :  { %v1441_v0 = vmov 0.0   ;;  %vm1442_vm0 = vmmov 0   ;;  %vm37_vm1 = vcmask 130048   ;;  %v121_v34 = vlaneseq  ;;  %s1444_s22 = smov 32   ;;  %s1445_s23 = smov 96   ;;  %s1988_s4 = inlined_call_operand.vmem [shape: f32[128,128], index: 4, kind: input, shape index: {}]   ;;  %s1989_s3 = inlined_call_operand.vmem [shape: f32[16,128], index: 3, kind: input, shape index: {}]   ;;  %s1990_s0 = inlined_call_operand.vmem [shape: f32[16,16], index: 0, kind: input, shape index: {}]   ;;  %s1991_s1 = inlined_call_operand.vmem [shape: f32[2,128], index: 1, kind: input, shape index: {}]   ;;  %s1992_s5 = inlined_call_operand.vmem [shape: f32[1,128], index: 5, kind: input, shape index: {}]   ;;  %s1993_s2 = inlined_call_operand.vmem [shape: f32[2,128], index: 2, kind: input, shape index: {}]   ;;  %s1994_s6 = inlined_call_operand.vmem [shape: f32[8,2,128], index: 6, kind: output, shape index: {0}]   ;;  %s1995_s8 = inlined_call_operand.vmem [shape: f32[2,128], index: 8, kind: output, shape index: {2}]   ;;  %s1996_s7 = inlined_call_operand.vmem [shape: f32[2,128], index: 7, kind: output, shape index: {1}]  }
   0x1   :  { %1092 = vmatprep.subr.mxu1 %v1441_v0  ;;  %v1495_v1 = vld [vmem:[%s1988_s4 + $0x78] sm:$0xff]  ;;  %v1500_v2 = vld [vmem:[%s1988_s4 + $0x70] sm:$0xff]  ;;  %1124 = vmatprep.mubr.msk.f32.mxu1 %vm1442_vm0, %v1441_v0  ;;  %v1509_v3 = vld [vmem:[%s1988_s4 + $0x68] sm:$0xff] }
   0x2   :  { %1093 = vmatpush3.msra.mxu1 %v1495_v1  ;;  %v29_v4 = vld [vmem:[%s1989_s3 + $0x8] sm:$0xff]  ;;  %v28_v5 = vld [vmem:[%s1989_s3] sm:$0xff]  ;;  %v1535_v9 = vld [vmem:[%s1988_s4 + $0x58] sm:$0xff]  ;;  %v122_v35 = vand.u32 127, %v121_v34 }
   0x3   :  { %1094 = vmatprep.subr.mxu1 %v1441_v0  ;;  %1085 = vmatprep.subr.mxu0 %v29_v4  ;;  %v1522_v6 = vld [vmem:[%s1988_s4 + $0x60] sm:$0xff]  ;;  %v27_v8 = vld [vmem:[%s1990_s0 + $0x8] sm:$0xff]  ;;  %v1542_v10 = vld [vmem:[%s1988_s4 + $0x50] sm:$0xff] }
   0x4   :  { %1095 = vmatpush3.msra.mxu1 %v1500_v2  ;;  %1086 = vmatpush3.msra.mxu0 %v29_v4  ;;  %v26_v7 = vld [vmem:[%s1990_s0] sm:$0xff]  ;;  %v1550_v11 = vld [vmem:[%s1988_s4 + $0x48] sm:$0xff]  ;;  %v1568_v13 = vld [vmem:[%s1988_s4 + $0x38] sm:$0xff]  ;;  %vm123_vm2 = vcmp.ge.s32.totalorder %v122_v35, 64  ;;  %vm124_vm3 = vcmp.lt.s32.totalorder %v122_v35, 96  ;;  %vm126_vm5 = vcmp.ge.s32.totalorder %v122_v35, 32 }
   0x5   :  { %1096 = vmatprep.subr.mxu1 %v1441_v0  ;;  %1087 = vmatprep.subr.mxu0 %v28_v5  ;;  %v1559_v12 = vld [vmem:[%s1988_s4 + $0x40] sm:$0xff]  ;;  %v1577_v14 = vld [vmem:[%s1988_s4 + $0x30] sm:$0xff]  ;;  %v1586_v15 = vld [vmem:[%s1988_s4 + $0x28] sm:$0xff]  ;;  %vm127_vm6 = vcmp.lt.s32.totalorder %v122_v35, 64 }
   0x6   :  { %1097 = vmatpush3.msra.mxu1 %v1509_v3  ;;  %1088 = vmatpush3.msra.mxu0 %v28_v5  ;;  %v1595_v16 = vld [vmem:[%s1988_s4 + $0x20] sm:$0xff]  ;;  %v1604_v17 = vld [vmem:[%s1988_s4 + $0x18] sm:$0xff]  ;;  %v1613_v18 = vld [vmem:[%s1988_s4 + $0x10] sm:$0xff] }
   0x7   :  { %1098 = vmatprep.subr.mxu1 %v1441_v0  ;;  %1089 = vmatprep.mubr.msk.f32.mxu0 %vm37_vm1, %v26_v7  ;;  %v1622_v19 = vld [vmem:[%s1988_s4 + $0x8] sm:$0xff]  ;;  %v1631_v20 = vld [vmem:[%s1988_s4] sm:$0xff]  ;;  %vm1693_vm4 = vmand %vm123_vm2, %vm124_vm3 }
   0x8   :  { %1099 = vmatpush3.msra.mxu1 %v1522_v6  ;;  %1090 = vmatmul.mubr.msk.f32.vlgmr.msra.gmra.mxu0 %vm37_vm1, %v27_v8  ;;  %v145_v21 = vld [vmem:[%s1991_s1] sm:$0x3]  ;;  %vm1705_vm7 = vmand %vm126_vm5, %vm127_vm6 }
   0x9   :  { %1100 = vmatprep.subr.mxu1 %v1441_v0  ;;  %1127 = vmatprep.subr.mxu0 %v1441_v0  ;;  %v920_v22 = vld [vmem:[%s1992_s5] ss:$0 sm:$0xff]  ;;  %s1443_s5 = smov 64  }
   0xa   :  { %1101 = vmatpush3.msra.mxu1 %v1535_v9  ;;  %1128 = vmatpush3.msra.mxu0 %v1495_v1  ;;  %v146_v41 = vld [vmem:[%s1993_s2] sm:$0x3] }
   0xb   :  { %1102 = vmatprep.subr.mxu1 %v1441_v0  ;;  %1129 = vmatprep.subr.mxu0 %v1441_v0 }
   0xc   :  { %1103 = vmatpush3.msra.mxu1 %v1542_v10  ;;  %1130 = vmatpush3.msra.mxu0 %v1500_v2 }
   0xd   :  { %1104 = vmatprep.subr.mxu1 %v1441_v0  ;;  %1131 = vmatprep.subr.mxu0 %v1441_v0 }
   0xe   :  { %1105 = vmatpush3.msra.mxu1 %v1550_v11  ;;  %1132 = vmatpush3.msra.mxu0 %v1509_v3 }
   0xf   :  { %1106 = vmatprep.subr.mxu1 %v1441_v0  ;;  %1133 = vmatprep.subr.mxu0 %v1441_v0 }
  0x10   :  { %1107 = vmatpush3.msra.mxu1 %v1559_v12  ;;  %1134 = vmatpush3.msra.mxu0 %v1522_v6 }
  0x11   :  { %1108 = vmatprep.subr.mxu1 %v1441_v0  ;;  %1135 = vmatprep.subr.mxu0 %v1441_v0 }
  0x12   :  { %1109 = vmatpush3.msra.mxu1 %v1568_v13  ;;  %1136 = vmatpush3.msra.mxu0 %v1535_v9 }
  0x13   :  { %1110 = vmatprep.subr.mxu1 %v1441_v0  ;;  %1137 = vmatprep.subr.mxu0 %v1441_v0 }
  0x14   :  { %1111 = vmatpush3.msra.mxu1 %v1577_v14  ;;  %1138 = vmatpush3.msra.mxu0 %v1542_v10 }
  0x15   :  { %1112 = vmatprep.subr.mxu1 %v1441_v0  ;;  %1139 = vmatprep.subr.mxu0 %v1441_v0 }
  0x16   :  { %1113 = vmatpush3.msra.mxu1 %v1586_v15  ;;  %1140 = vmatpush3.msra.mxu0 %v1550_v11 }
  0x17   :  { %1114 = vmatprep.subr.mxu1 %v1441_v0  ;;  %1141 = vmatprep.subr.mxu0 %v1441_v0 }
  0x18   :  { %1115 = vmatpush3.msra.mxu1 %v1595_v16  ;;  %1142 = vmatpush3.msra.mxu0 %v1559_v12 }
  0x19   :  { %1116 = vmatprep.subr.mxu1 %v1441_v0  ;;  %1143 = vmatprep.subr.mxu0 %v1441_v0 }
  0x1a   :  { %1117 = vmatpush3.msra.mxu1 %v1604_v17  ;;  %1144 = vmatpush3.msra.mxu0 %v1568_v13 }
  0x1b   :  { %1118 = vmatprep.subr.mxu1 %v1441_v0  ;;  %1145 = vmatprep.subr.mxu0 %v1441_v0 }
  0x1c   :  { %1119 = vmatpush3.msra.mxu1 %v1613_v18  ;;  %1146 = vmatpush3.msra.mxu0 %v1577_v14 }
  0x1d   :  { %1120 = vmatprep.subr.mxu1 %v1441_v0  ;;  %1147 = vmatprep.subr.mxu0 %v1441_v0 }
  0x1e   :  { %1121 = vmatpush3.msra.mxu1 %v1622_v19  ;;  %1148 = vmatpush3.msra.mxu0 %v1586_v15 }
  0x1f   :  { %1122 = vmatprep.subr.mxu1 %v1441_v0  ;;  %1149 = vmatprep.subr.mxu0 %v1441_v0 }
  0x20   :  { %1123 = vmatpush3.msra.mxu1 %v1631_v20  ;;  %1150 = vmatpush3.msra.mxu0 %v1595_v16 }
  0x21   :  { %1125 = vmatmul.mubr.f32.vlgmr.msra.gmra.mxu1 %v145_v21  ;;  %1151 = vmatprep.subr.mxu0 %v1441_v0 }
  0x22   :  { %1159 = vmatprep.mubr.msk.f32.mxu0 %vm1442_vm0, %v1441_v0  ;;  %1152 = vmatpush3.msra.mxu0 %v1604_v17 }
  0x23   :  { %1162 = vmatprep.subr.mxu1 %v1441_v0  ;;  %1153 = vmatprep.subr.mxu0 %v1441_v0 }
  0x24   :  { %1163 = vmatpush3.msra.mxu1 %v1495_v1  ;;  %1154 = vmatpush3.msra.mxu0 %v1613_v18 }
  0x25   :  { %1164 = vmatprep.subr.mxu1 %v1441_v0  ;;  %1155 = vmatprep.subr.mxu0 %v1441_v0 }
  0x26   :  { %1165 = vmatpush3.msra.mxu1 %v1500_v2  ;;  %1156 = vmatpush3.msra.mxu0 %v1622_v19 }
  0x27   :  { %1166 = vmatprep.subr.mxu1 %v1441_v0  ;;  %1157 = vmatprep.subr.mxu0 %v1441_v0 }
  0x28   :  { %1167 = vmatpush3.msra.mxu1 %v1509_v3  ;;  %1158 = vmatpush3.msra.mxu0 %v1631_v20 }
  0x29   :  { %1168 = vmatprep.subr.mxu1 %v1441_v0  ;;  %1194 = vmatprep.mubr.msk.f32.mxu1 %vm1442_vm0, %v1441_v0 }
  0x2a   :  { %1169 = vmatpush3.msra.mxu1 %v1522_v6  ;;  %1197 = vmatprep.subr.mxu0 %v1441_v0 }
  0x2b   :  { %1170 = vmatprep.subr.mxu1 %v1441_v0 }
  0x2c   :  { %1171 = vmatpush3.msra.mxu1 %v1535_v9 }
  0x2d   :  { %1172 = vmatprep.subr.mxu1 %v1441_v0 }
  0x2e   :  { %1173 = vmatpush3.msra.mxu1 %v1542_v10 }
  0x2f   :  { %1174 = vmatprep.subr.mxu1 %v1441_v0 }
  0x30   :  { %1175 = vmatpush3.msra.mxu1 %v1550_v11 }
  0x31   :  { %1176 = vmatprep.subr.mxu1 %v1441_v0 }
  0x32   :  { %1177 = vmatpush3.msra.mxu1 %v1559_v12 }
  0x33   :  { %1178 = vmatprep.subr.mxu1 %v1441_v0 }
  0x34   :  { %1179 = vmatpush3.msra.mxu1 %v1568_v13 }
  0x35   :  { %1180 = vmatprep.subr.mxu1 %v1441_v0 }
  0x36   :  { %1181 = vmatpush3.msra.mxu1 %v1577_v14 }
  0x37   :  { %1182 = vmatprep.subr.mxu1 %v1441_v0 }
  0x38   :  { %1183 = vmatpush3.msra.mxu1 %v1586_v15 }
  0x39   :  { %1184 = vmatprep.subr.mxu1 %v1441_v0 }
  0x3a   :  { %1185 = vmatpush3.msra.mxu1 %v1595_v16 }
  0x3b   :  { %1186 = vmatprep.subr.mxu1 %v1441_v0 }
  0x3c   :  { %1187 = vmatpush3.msra.mxu1 %v1604_v17 }
  0x3d   :  { %1188 = vmatprep.subr.mxu1 %v1441_v0 }
  0x3e   :  { %1189 = vmatpush3.msra.mxu1 %v1613_v18 }
  0x3f   :  { %1190 = vmatprep.subr.mxu1 %v1441_v0 }
  0x40   :  { %1191 = vmatpush3.msra.mxu1 %v1622_v19 }
  0x41   :  { %1192 = vmatprep.subr.mxu1 %v1441_v0 }
  0x42   :  { %1193 = vmatpush3.msra.mxu1 %v1631_v20 }
  0x43   :  { %1232 = vmatprep.subr.mxu1 %v1441_v0 }
  0xc8   :  { %v1091_v23 = vpop.f32.mrf.mxu0 }
  0xc9   :  { %v116_v24 = vadd.f32 %v1091_v23, %v920_v22 }
  0xca   :  { %v110_v25 = vpop.f32.mrf.mxu0 }
  0xcb   :  { %120 = vst [vmem:[#allocation2 + $0x8] sm:$0xff] %v116_v24  ;;  %v111_v26 = vadd.f32 %v920_v22, %v110_v25 }
  0xcd   :  { %119 = vst [vmem:[#allocation2] sm:$0xff] %v111_v26 }
  0xd4   :  { %v147_v27 = vld [vmem:[#allocation2] sm:$0x3]  ;;  %v241_v52 = vld [vmem:[#allocation2 + $0x2] sm:$0x3]  ;;  %v336_v25 = vld [vmem:[#allocation2 + $0x4] sm:$0x3] }
  0xe1   :  { %v214_v28 = vpop.f32.mrf.mxu1 }
  0xe2   :  { %v218_v29 = vadd.f32 %v214_v28, %v147_v27 }
  0xe3   :  { %v1126_v30 = vpop.f32.mrf.mxu1 }
  0xe4   :  { %v923_v31 = vmul.f32 -1.442695, %v218_v29 }
  0xe6   :  { %1377 = vpow2.f32 %v923_v31 }
  0xe7   :  { %1379 = vtanh.f32 %v218_v29 }
  0xf3   :  { %v1378_v32 = vpop.eup %1377 }
  0xf4   :  { %v223_v33 = vadd.f32 1.0, %v1378_v32  ;;  %v1380_v37 = vpop.eup %1379 }
  0xf6   :  { %1381 = vrcp.f32 %v223_v33 }
 0x103   :  { %v1382_v38 = vpop.eup %1381 }
 0x104   :  { %v226_v39 = vsel %vm1693_vm4, %v1380_v37, %v1382_v38 }
 0x105   :  { %231 = vrot.lane.b32.xlu1 %v226_v39, %s1443_s5  ;;  %227 = vrot.lane.b32.xlu0 %v226_v39, %s1444_s22  ;;  %v233_v43 = vmul.f32 %v226_v39, %v146_v41 }
 0x109   :  { %229 = vrot.lane.b32.xlu0 %v226_v39, %s1445_s23 }
 0x177   :  { %v228_v40 = vpop.permute.xlu0 %227  ;;  %v232_v49 = vpop.permute.xlu1 %231 }
 0x17b   :  { %v230_v42 = vpop.permute.xlu0 %229 }
 0x17c   :  { %v234_v44 = vmul.f32 %v230_v42, %v228_v40 }
 0x17e   :  { %v235_v46 = vadd.f32 %v234_v44, %v233_v43 }
 0x180   :  { %v236_v47 = vsel %vm1705_vm7, %v235_v46, 0.0 }
 0x181   :  { %1383 = vtanh.f32 %v236_v47 }
 0x18e   :  { %v1384_v48 = vpop.eup %1383 }
 0x18f   :  { %v238_v50 = vmul.f32 %v1384_v48, %v232_v49 }
 0x191   :  { %v239_v51 = vsel %vm1705_vm7, %v238_v50, 0.0  ;;  %1160 = vmatmul.mubr.msk.f32.vlgmr.msra.gmra.mxu0 %vm1705_vm7, %v238_v50 }
 0x192   :  { %240 = vst [vmem:[%s1994_s6] sm:$0x3] %v239_v51  ;;  %1198 = vmatpush3.msra.mxu0 %v1495_v1  ;;  %1229 = vmatprep.mubr.msk.f32.mxu0 %vm1442_vm0, %v1441_v0 }
 0x193   :  { %1199 = vmatprep.subr.mxu0 %v1441_v0 }
 0x194   :  { %1200 = vmatpush3.msra.mxu0 %v1500_v2 }
 0x195   :  { %1201 = vmatprep.subr.mxu0 %v1441_v0 }
 0x196   :  { %1202 = vmatpush3.msra.mxu0 %v1509_v3 }
 0x197   :  { %1203 = vmatprep.subr.mxu0 %v1441_v0 }
 0x198   :  { %1204 = vmatpush3.msra.mxu0 %v1522_v6 }
 0x199   :  { %1205 = vmatprep.subr.mxu0 %v1441_v0 }
 0x19a   :  { %1206 = vmatpush3.msra.mxu0 %v1535_v9 }
 0x19b   :  { %1207 = vmatprep.subr.mxu0 %v1441_v0 }
 0x19c   :  { %1208 = vmatpush3.msra.mxu0 %v1542_v10 }
 0x19d   :  { %1209 = vmatprep.subr.mxu0 %v1441_v0 }
 0x19e   :  { %1210 = vmatpush3.msra.mxu0 %v1550_v11 }
 0x19f   :  { %1211 = vmatprep.subr.mxu0 %v1441_v0 }
 0x1a0   :  { %1212 = vmatpush3.msra.mxu0 %v1559_v12 }
 0x1a1   :  { %1213 = vmatprep.subr.mxu0 %v1441_v0 }
 0x1a2   :  { %1214 = vmatpush3.msra.mxu0 %v1568_v13 }
 0x1a3   :  { %1215 = vmatprep.subr.mxu0 %v1441_v0 }
 0x1a4   :  { %1216 = vmatpush3.msra.mxu0 %v1577_v14 }
 0x1a5   :  { %1217 = vmatprep.subr.mxu0 %v1441_v0 }
 0x1a6   :  { %1218 = vmatpush3.msra.mxu0 %v1586_v15 }
 0x1a7   :  { %1219 = vmatprep.subr.mxu0 %v1441_v0 }
 0x1a8   :  { %1220 = vmatpush3.msra.mxu0 %v1595_v16 }
 0x1a9   :  { %1221 = vmatprep.subr.mxu0 %v1441_v0 }
 0x1aa   :  { %1222 = vmatpush3.msra.mxu0 %v1604_v17 }
 0x1ab   :  { %1223 = vmatprep.subr.mxu0 %v1441_v0 }
 0x1ac   :  { %1224 = vmatpush3.msra.mxu0 %v1613_v18 }
 0x1ad   :  { %1225 = vmatprep.subr.mxu0 %v1441_v0 }
 0x1ae   :  { %1226 = vmatpush3.msra.mxu0 %v1622_v19 }
 0x1af   :  { %1227 = vmatprep.subr.mxu0 %v1441_v0 }
 0x1b0   :  { %1228 = vmatpush3.msra.mxu0 %v1631_v20 }
 0x1b1   :  { %1267 = vmatprep.subr.mxu0 %v1441_v0 }
 0x251   :  { %v308_v53 = vpop.f32.mrf.mxu0 }
 0x252   :  { %v312_v54 = vadd.f32 %v308_v53, %v241_v52 }
 0x253   :  { %v1161_v55 = vpop.f32.mrf.mxu0 }
 0x254   :  { %v925_v56 = vmul.f32 -1.442695, %v312_v54 }
 0x256   :  { %1385 = vpow2.f32 %v925_v56 }
 0x257   :  { %1387 = vtanh.f32 %v312_v54 }
 0x263   :  { %v1386_v57 = vpop.eup %1385 }
 0x264   :  { %v317_v58 = vadd.f32 1.0, %v1386_v57  ;;  %v1388_v59 = vpop.eup %1387 }
 0x266   :  { %1389 = vrcp.f32 %v317_v58 }
 0x273   :  { %v1390_v60 = vpop.eup %1389 }
 0x274   :  { %v320_v61 = vsel %vm1693_vm4, %v1388_v59, %v1390_v60 }
 0x275   :  { %323 = vrot.lane.b32.xlu0 %v320_v61, %s1445_s23  ;;  %321 = vrot.lane.b32.xlu1 %v320_v61, %s1444_s22  ;;  %v327_v4 = vmul.f32 %v320_v61, %v236_v47  ;;  %v431_v47 = vld [vmem:[#allocation2 + $0x6] sm:$0x3] }
 0x279   :  { %325 = vrot.lane.b32.xlu1 %v320_v61, %s1443_s5 }
 0x2e7   :  { %v324_v62 = vpop.permute.xlu0 %323  ;;  %v322_v63 = vpop.permute.xlu1 %321 }
 0x2e8   :  { %v328_v5 = vmul.f32 %v324_v62, %v322_v63 }
 0x2ea   :  { %v329_v7 = vadd.f32 %v328_v5, %v327_v4 }
 0x2eb   :  { %v326_v22 = vpop.permute.xlu1 %325 }
 0x2ec   :  { %v330_v8 = vsel %vm1705_vm7, %v329_v7, 0.0 }
 0x2ed   :  { %1391 = vtanh.f32 %v330_v8 }
 0x2fa   :  { %v1392_v21 = vpop.eup %1391 }
 0x2fb   :  { %v332_v23 = vmul.f32 %v1392_v21, %v326_v22 }
 0x2fd   :  { %v333_v24 = vsel %vm1705_vm7, %v332_v23, 0.0  ;;  %1195 = vmatmul.mubr.msk.f32.vlgmr.msra.gmra.mxu1 %vm1705_vm7, %v332_v23 }
 0x2fe   :  { %926 = vst [vmem:[%s1994_s6 + $0x2] sm:$0x3] %v333_v24  ;;  %1233 = vmatpush3.msra.mxu1 %v1495_v1  ;;  %1264 = vmatprep.mubr.msk.f32.mxu1 %vm1442_vm0, %v1441_v0 }
 0x2ff   :  { %1234 = vmatprep.subr.mxu1 %v1441_v0 }
 0x300   :  { %1235 = vmatpush3.msra.mxu1 %v1500_v2 }
 0x301   :  { %1236 = vmatprep.subr.mxu1 %v1441_v0 }
 0x302   :  { %1237 = vmatpush3.msra.mxu1 %v1509_v3 }
 0x303   :  { %1238 = vmatprep.subr.mxu1 %v1441_v0 }
 0x304   :  { %1239 = vmatpush3.msra.mxu1 %v1522_v6 }
 0x305   :  { %1240 = vmatprep.subr.mxu1 %v1441_v0 }
 0x306   :  { %1241 = vmatpush3.msra.mxu1 %v1535_v9 }
 0x307   :  { %1242 = vmatprep.subr.mxu1 %v1441_v0 }
 0x308   :  { %1243 = vmatpush3.msra.mxu1 %v1542_v10 }
 0x309   :  { %1244 = vmatprep.subr.mxu1 %v1441_v0 }
 0x30a   :  { %1245 = vmatpush3.msra.mxu1 %v1550_v11 }
 0x30b   :  { %1246 = vmatprep.subr.mxu1 %v1441_v0 }
 0x30c   :  { %1247 = vmatpush3.msra.mxu1 %v1559_v12 }
 0x30d   :  { %1248 = vmatprep.subr.mxu1 %v1441_v0 }
 0x30e   :  { %1249 = vmatpush3.msra.mxu1 %v1568_v13 }
 0x30f   :  { %1250 = vmatprep.subr.mxu1 %v1441_v0 }
 0x310   :  { %1251 = vmatpush3.msra.mxu1 %v1577_v14 }
 0x311   :  { %1252 = vmatprep.subr.mxu1 %v1441_v0 }
 0x312   :  { %1253 = vmatpush3.msra.mxu1 %v1586_v15 }
 0x313   :  { %1254 = vmatprep.subr.mxu1 %v1441_v0 }
 0x314   :  { %1255 = vmatpush3.msra.mxu1 %v1595_v16 }
 0x315   :  { %1256 = vmatprep.subr.mxu1 %v1441_v0 }
 0x316   :  { %1257 = vmatpush3.msra.mxu1 %v1604_v17 }
 0x317   :  { %1258 = vmatprep.subr.mxu1 %v1441_v0 }
 0x318   :  { %1259 = vmatpush3.msra.mxu1 %v1613_v18 }
 0x319   :  { %1260 = vmatprep.subr.mxu1 %v1441_v0 }
 0x31a   :  { %1261 = vmatpush3.msra.mxu1 %v1622_v19 }
 0x31b   :  { %1262 = vmatprep.subr.mxu1 %v1441_v0 }
 0x31c   :  { %1263 = vmatpush3.msra.mxu1 %v1631_v20 }
 0x31d   :  { %1302 = vmatprep.subr.mxu1 %v1441_v0 }
 0x3bd   :  { %v403_v26 = vpop.f32.mrf.mxu1 }
 0x3be   :  { %v407_v27 = vadd.f32 %v403_v26, %v336_v25 }
 0x3bf   :  { %v1196_v28 = vpop.f32.mrf.mxu1 }
 0x3c0   :  { %v928_v29 = vmul.f32 -1.442695, %v407_v27 }
 0x3c2   :  { %1393 = vpow2.f32 %v928_v29 }
 0x3c3   :  { %1395 = vtanh.f32 %v407_v27 }
 0x3cf   :  { %v1394_v30 = vpop.eup %1393 }
 0x3d0   :  { %v412_v31 = vadd.f32 1.0, %v1394_v30  ;;  %v1396_v32 = vpop.eup %1395 }
 0x3d2   :  { %1397 = vrcp.f32 %v412_v31 }
 0x3df   :  { %v1398_v33 = vpop.eup %1397 }
 0x3e0   :  { %v415_v34 = vsel %vm1693_vm4, %v1396_v32, %v1398_v33 }
 0x3e1   :  { %418 = vrot.lane.b32.xlu1 %v415_v34, %s1445_s23  ;;  %416 = vrot.lane.b32.xlu0 %v415_v34, %s1444_s22  ;;  %v422_v38 = vmul.f32 %v415_v34, %v330_v8  ;;  %v526_v8 = vld [vmem:[#allocation2 + $0x8] sm:$0x3] }
 0x3e5   :  { %420 = vrot.lane.b32.xlu0 %v415_v34, %s1443_s5 }
 0x453   :  { %v419_v35 = vpop.permute.xlu1 %418  ;;  %v417_v37 = vpop.permute.xlu0 %416 }
 0x454   :  { %v423_v39 = vmul.f32 %v419_v35, %v417_v37 }
 0x456   :  { %v424_v40 = vadd.f32 %v423_v39, %v422_v38 }
 0x457   :  { %v421_v43 = vpop.permute.xlu0 %420 }
 0x458   :  { %v425_v41 = vsel %vm1705_vm7, %v424_v40, 0.0 }
 0x459   :  { %1399 = vtanh.f32 %v425_v41 }
 0x466   :  { %v1400_v42 = vpop.eup %1399 }
 0x467   :  { %v427_v44 = vmul.f32 %v1400_v42, %v421_v43 }
 0x469   :  { %v428_v46 = vsel %vm1705_vm7, %v427_v44, 0.0  ;;  %1230 = vmatmul.mubr.msk.f32.vlgmr.msra.gmra.mxu0 %vm1705_vm7, %v427_v44  ;;  %v716_v44 = vld [vmem:[#allocation2 + $0xc] sm:$0x3] }
 0x46a   :  { %929 = vst [vmem:[%s1994_s6 + $0x4] sm:$0x3] %v428_v46  ;;  %1268 = vmatpush3.msra.mxu0 %v1495_v1  ;;  %1299 = vmatprep.mubr.msk.f32.mxu0 %vm1442_vm0, %v1441_v0 }
 0x46b   :  { %1269 = vmatprep.subr.mxu0 %v1441_v0 }
 0x46c   :  { %1270 = vmatpush3.msra.mxu0 %v1500_v2 }
 0x46d   :  { %1271 = vmatprep.subr.mxu0 %v1441_v0 }
 0x46e   :  { %1272 = vmatpush3.msra.mxu0 %v1509_v3 }
 0x46f   :  { %1273 = vmatprep.subr.mxu0 %v1441_v0 }
 0x470   :  { %1274 = vmatpush3.msra.mxu0 %v1522_v6 }
 0x471   :  { %1275 = vmatprep.subr.mxu0 %v1441_v0 }
 0x472   :  { %1276 = vmatpush3.msra.mxu0 %v1535_v9 }
 0x473   :  { %1277 = vmatprep.subr.mxu0 %v1441_v0 }
 0x474   :  { %1278 = vmatpush3.msra.mxu0 %v1542_v10 }
 0x475   :  { %1279 = vmatprep.subr.mxu0 %v1441_v0 }
 0x476   :  { %1280 = vmatpush3.msra.mxu0 %v1550_v11 }
 0x477   :  { %1281 = vmatprep.subr.mxu0 %v1441_v0 }
 0x478   :  { %1282 = vmatpush3.msra.mxu0 %v1559_v12 }
 0x479   :  { %1283 = vmatprep.subr.mxu0 %v1441_v0 }
 0x47a   :  { %1284 = vmatpush3.msra.mxu0 %v1568_v13 }
 0x47b   :  { %1285 = vmatprep.subr.mxu0 %v1441_v0 }
 0x47c   :  { %1286 = vmatpush3.msra.mxu0 %v1577_v14 }
 0x47d   :  { %1287 = vmatprep.subr.mxu0 %v1441_v0 }
 0x47e   :  { %1288 = vmatpush3.msra.mxu0 %v1586_v15 }
 0x47f   :  { %1289 = vmatprep.subr.mxu0 %v1441_v0 }
 0x480   :  { %1290 = vmatpush3.msra.mxu0 %v1595_v16 }
 0x481   :  { %1291 = vmatprep.subr.mxu0 %v1441_v0 }
 0x482   :  { %1292 = vmatpush3.msra.mxu0 %v1604_v17 }
 0x483   :  { %1293 = vmatprep.subr.mxu0 %v1441_v0 }
 0x484   :  { %1294 = vmatpush3.msra.mxu0 %v1613_v18 }
 0x485   :  { %1295 = vmatprep.subr.mxu0 %v1441_v0 }
 0x486   :  { %1296 = vmatpush3.msra.mxu0 %v1622_v19 }
 0x487   :  { %1297 = vmatprep.subr.mxu0 %v1441_v0 }
 0x488   :  { %1298 = vmatpush3.msra.mxu0 %v1631_v20 }
 0x489   :  { %1337 = vmatprep.subr.mxu0 %v1441_v0 }
 0x529   :  { %v498_v48 = vpop.f32.mrf.mxu0 }
 0x52a   :  { %v502_v49 = vadd.f32 %v498_v48, %v431_v47 }
 0x52b   :  { %v1231_v50 = vpop.f32.mrf.mxu0 }
 0x52c   :  { %v931_v51 = vmul.f32 -1.442695, %v502_v49 }
 0x52e   :  { %1401 = vpow2.f32 %v931_v51 }
 0x52f   :  { %1403 = vtanh.f32 %v502_v49 }
 0x53b   :  { %v1402_v52 = vpop.eup %1401 }
 0x53c   :  { %v507_v53 = vadd.f32 1.0, %v1402_v52  ;;  %v1404_v54 = vpop.eup %1403 }
 0x53e   :  { %1405 = vrcp.f32 %v507_v53 }
 0x54b   :  { %v1406_v55 = vpop.eup %1405 }
 0x54c   :  { %v510_v56 = vsel %vm1693_vm4, %v1404_v54, %v1406_v55 }
 0x54d   :  { %513 = vrot.lane.b32.xlu0 %v510_v56, %s1445_s23  ;;  %511 = vrot.lane.b32.xlu1 %v510_v56, %s1444_s22  ;;  %v517_v59 = vmul.f32 %v510_v56, %v425_v41 }
 0x551   :  { %515 = vrot.lane.b32.xlu1 %v510_v56, %s1443_s5 }
 0x5bf   :  { %v514_v57 = vpop.permute.xlu0 %513  ;;  %v512_v58 = vpop.permute.xlu1 %511 }
 0x5c0   :  { %v518_v60 = vmul.f32 %v514_v57, %v512_v58 }
 0x5c2   :  { %v519_v61 = vadd.f32 %v518_v60, %v517_v59 }
 0x5c3   :  { %v516_v4 = vpop.permute.xlu1 %515 }
 0x5c4   :  { %v520_v62 = vsel %vm1705_vm7, %v519_v61, 0.0 }
 0x5c5   :  { %1407 = vtanh.f32 %v520_v62 }
 0x5d2   :  { %v1408_v63 = vpop.eup %1407 }
 0x5d3   :  { %v522_v5 = vmul.f32 %v1408_v63, %v516_v4 }
 0x5d5   :  { %v523_v7 = vsel %vm1705_vm7, %v522_v5, 0.0  ;;  %1265 = vmatmul.mubr.msk.f32.vlgmr.msra.gmra.mxu1 %vm1705_vm7, %v522_v5  ;;  %v811_v5 = vld [vmem:[#allocation2 + $0xe] sm:$0x3] }
 0x5d6   :  { %932 = vst [vmem:[%s1994_s6 + $0x6] sm:$0x3] %v523_v7  ;;  %1303 = vmatpush3.msra.mxu1 %v1495_v1  ;;  %1334 = vmatprep.mubr.msk.f32.mxu1 %vm1442_vm0, %v1441_v0 }
 0x5d7   :  { %1304 = vmatprep.subr.mxu1 %v1441_v0 }
 0x5d8   :  { %1305 = vmatpush3.msra.mxu1 %v1500_v2 }
 0x5d9   :  { %1306 = vmatprep.subr.mxu1 %v1441_v0 }
 0x5da   :  { %1307 = vmatpush3.msra.mxu1 %v1509_v3 }
 0x5db   :  { %1308 = vmatprep.subr.mxu1 %v1441_v0 }
 0x5dc   :  { %1309 = vmatpush3.msra.mxu1 %v1522_v6 }
 0x5dd   :  { %1310 = vmatprep.subr.mxu1 %v1441_v0 }
 0x5de   :  { %1311 = vmatpush3.msra.mxu1 %v1535_v9 }
 0x5df   :  { %1312 = vmatprep.subr.mxu1 %v1441_v0 }
 0x5e0   :  { %1313 = vmatpush3.msra.mxu1 %v1542_v10 }
 0x5e1   :  { %1314 = vmatprep.subr.mxu1 %v1441_v0 }
 0x5e2   :  { %1315 = vmatpush3.msra.mxu1 %v1550_v11 }
 0x5e3   :  { %1316 = vmatprep.subr.mxu1 %v1441_v0 }
 0x5e4   :  { %1317 = vmatpush3.msra.mxu1 %v1559_v12 }
 0x5e5   :  { %1318 = vmatprep.subr.mxu1 %v1441_v0 }
 0x5e6   :  { %1319 = vmatpush3.msra.mxu1 %v1568_v13 }
 0x5e7   :  { %1320 = vmatprep.subr.mxu1 %v1441_v0 }
 0x5e8   :  { %1321 = vmatpush3.msra.mxu1 %v1577_v14 }
 0x5e9   :  { %1322 = vmatprep.subr.mxu1 %v1441_v0 }
 0x5ea   :  { %1323 = vmatpush3.msra.mxu1 %v1586_v15 }
 0x5eb   :  { %1324 = vmatprep.subr.mxu1 %v1441_v0 }
 0x5ec   :  { %1325 = vmatpush3.msra.mxu1 %v1595_v16 }
 0x5ed   :  { %1326 = vmatprep.subr.mxu1 %v1441_v0 }
 0x5ee   :  { %1327 = vmatpush3.msra.mxu1 %v1604_v17 }
 0x5ef   :  { %1328 = vmatprep.subr.mxu1 %v1441_v0 }
 0x5f0   :  { %1329 = vmatpush3.msra.mxu1 %v1613_v18 }
 0x5f1   :  { %1330 = vmatprep.subr.mxu1 %v1441_v0 }
 0x5f2   :  { %1331 = vmatpush3.msra.mxu1 %v1622_v19 }
 0x5f3   :  { %1332 = vmatprep.subr.mxu1 %v1441_v0 }
 0x5f4   :  { %1333 = vmatpush3.msra.mxu1 %v1631_v20 }
 0x695   :  { %v593_v21 = vpop.f32.mrf.mxu1 }
 0x696   :  { %v597_v22 = vadd.f32 %v593_v21, %v526_v8 }
 0x697   :  { %v1266_v23 = vpop.f32.mrf.mxu1 }
 0x698   :  { %v934_v24 = vmul.f32 -1.442695, %v597_v22 }
 0x69a   :  { %1409 = vpow2.f32 %v934_v24 }
 0x69b   :  { %1411 = vtanh.f32 %v597_v22 }
 0x6a7   :  { %v1410_v25 = vpop.eup %1409 }
 0x6a8   :  { %v602_v26 = vadd.f32 1.0, %v1410_v25  ;;  %v1412_v27 = vpop.eup %1411 }
 0x6aa   :  { %1413 = vrcp.f32 %v602_v26 }
 0x6b7   :  { %v1414_v28 = vpop.eup %1413 }
 0x6b8   :  { %v605_v29 = vsel %vm1693_vm4, %v1412_v27, %v1414_v28 }
 0x6b9   :  { %608 = vrot.lane.b32.xlu1 %v605_v29, %s1445_s23  ;;  %606 = vrot.lane.b32.xlu0 %v605_v29, %s1444_s22  ;;  %v612_v32 = vmul.f32 %v605_v29, %v520_v62 }
 0x6bd   :  { %610 = vrot.lane.b32.xlu0 %v605_v29, %s1443_s5 }
 0x72b   :  { %v609_v30 = vpop.permute.xlu1 %608  ;;  %v607_v31 = vpop.permute.xlu0 %606 }
 0x72c   :  { %v613_v33 = vmul.f32 %v609_v30, %v607_v31 }
 0x72e   :  { %v614_v34 = vadd.f32 %v613_v33, %v612_v32 }
 0x72f   :  { %v611_v38 = vpop.permute.xlu0 %610 }
 0x730   :  { %v615_v35 = vsel %vm1705_vm7, %v614_v34, 0.0 }
 0x731   :  { %1415 = vtanh.f32 %v615_v35 }
 0x73e   :  { %v1416_v37 = vpop.eup %1415 }
 0x73f   :  { %v617_v39 = vmul.f32 %v1416_v37, %v611_v38 }
 0x741   :  { %v618_v40 = vsel %vm1705_vm7, %v617_v39, 0.0  ;;  %1300 = vmatmul.mubr.msk.f32.vlgmr.msra.gmra.mxu0 %vm1705_vm7, %v617_v39 }
 0x742   :  { %935 = vst [vmem:[%s1994_s6 + $0x8] sm:$0x3] %v618_v40  ;;  %1338 = vmatpush3.msra.mxu0 %v1495_v1  ;;  %1369 = vmatprep.mubr.msk.f32.mxu0 %vm1442_vm0, %v1441_v0  ;;  %v621_v1 = vld [vmem:[#allocation2 + $0xa] sm:$0x3] }
 0x743   :  { %1339 = vmatprep.subr.mxu0 %v1441_v0 }
 0x744   :  { %1340 = vmatpush3.msra.mxu0 %v1500_v2 }
 0x745   :  { %1341 = vmatprep.subr.mxu0 %v1441_v0 }
 0x746   :  { %1342 = vmatpush3.msra.mxu0 %v1509_v3 }
 0x747   :  { %1343 = vmatprep.subr.mxu0 %v1441_v0 }
 0x748   :  { %1344 = vmatpush3.msra.mxu0 %v1522_v6 }
 0x749   :  { %1345 = vmatprep.subr.mxu0 %v1441_v0 }
 0x74a   :  { %1346 = vmatpush3.msra.mxu0 %v1535_v9 }
 0x74b   :  { %1347 = vmatprep.subr.mxu0 %v1441_v0 }
 0x74c   :  { %1348 = vmatpush3.msra.mxu0 %v1542_v10 }
 0x74d   :  { %1349 = vmatprep.subr.mxu0 %v1441_v0 }
 0x74e   :  { %1350 = vmatpush3.msra.mxu0 %v1550_v11 }
 0x74f   :  { %1351 = vmatprep.subr.mxu0 %v1441_v0 }
 0x750   :  { %1352 = vmatpush3.msra.mxu0 %v1559_v12 }
 0x751   :  { %1353 = vmatprep.subr.mxu0 %v1441_v0 }
 0x752   :  { %1354 = vmatpush3.msra.mxu0 %v1568_v13 }
 0x753   :  { %1355 = vmatprep.subr.mxu0 %v1441_v0 }
 0x754   :  { %1356 = vmatpush3.msra.mxu0 %v1577_v14 }
 0x755   :  { %1357 = vmatprep.subr.mxu0 %v1441_v0 }
 0x756   :  { %1358 = vmatpush3.msra.mxu0 %v1586_v15 }
 0x757   :  { %1359 = vmatprep.subr.mxu0 %v1441_v0 }
 0x758   :  { %1360 = vmatpush3.msra.mxu0 %v1595_v16 }
 0x759   :  { %1361 = vmatprep.subr.mxu0 %v1441_v0 }
 0x75a   :  { %1362 = vmatpush3.msra.mxu0 %v1604_v17 }
 0x75b   :  { %1363 = vmatprep.subr.mxu0 %v1441_v0 }
 0x75c   :  { %1364 = vmatpush3.msra.mxu0 %v1613_v18 }
 0x75d   :  { %1365 = vmatprep.subr.mxu0 %v1441_v0 }
 0x75e   :  { %1366 = vmatpush3.msra.mxu0 %v1622_v19 }
 0x75f   :  { %1367 = vmatprep.subr.mxu0 %v1441_v0 }
 0x760   :  { %1368 = vmatpush3.msra.mxu0 %v1631_v20 }
 0x801   :  { %v688_v2 = vpop.f32.mrf.mxu0 }
 0x802   :  { %v692_v3 = vadd.f32 %v688_v2, %v621_v1 }
 0x803   :  { %v1301_v6 = vpop.f32.mrf.mxu0 }
 0x804   :  { %v937_v9 = vmul.f32 -1.442695, %v692_v3 }
 0x806   :  { %1417 = vpow2.f32 %v937_v9 }
 0x807   :  { %1419 = vtanh.f32 %v692_v3 }
 0x813   :  { %v1418_v10 = vpop.eup %1417 }
 0x814   :  { %v697_v11 = vadd.f32 1.0, %v1418_v10  ;;  %v1420_v12 = vpop.eup %1419 }
 0x816   :  { %1421 = vrcp.f32 %v697_v11 }
 0x823   :  { %v1422_v13 = vpop.eup %1421 }
 0x824   :  { %v700_v14 = vsel %vm1693_vm4, %v1420_v12, %v1422_v13 }
 0x825   :  { %703 = vrot.lane.b32.xlu0 %v700_v14, %s1445_s23  ;;  %701 = vrot.lane.b32.xlu1 %v700_v14, %s1444_s22  ;;  %v707_v16 = vmul.f32 %v700_v14, %v615_v35 }
 0x829   :  { %705 = vrot.lane.b32.xlu1 %v700_v14, %s1443_s5 }
 0x897   :  { %v704_v0 = vpop.permute.xlu0 %703  ;;  %v702_v15 = vpop.permute.xlu1 %701 }
 0x898   :  { %v708_v17 = vmul.f32 %v704_v0, %v702_v15 }
 0x89a   :  { %v709_v18 = vadd.f32 %v708_v17, %v707_v16 }
 0x89b   :  { %v706_v41 = vpop.permute.xlu1 %705 }
 0x89c   :  { %v710_v19 = vsel %vm1705_vm7, %v709_v18, 0.0 }
 0x89d   :  { %1423 = vtanh.f32 %v710_v19 }
 0x8aa   :  { %v1424_v20 = vpop.eup %1423 }
 0x8ab   :  { %v712_v42 = vmul.f32 %v1424_v20, %v706_v41 }
 0x8ad   :  { %v713_v43 = vsel %vm1705_vm7, %v712_v42, 0.0  ;;  %1335 = vmatmul.mubr.msk.f32.vlgmr.msra.gmra.mxu1 %vm1705_vm7, %v712_v42 }
 0x8ae   :  { %938 = vst [vmem:[%s1994_s6 + $0xa] sm:$0x3] %v713_v43 }
 0x96d   :  { %v783_v46 = vpop.f32.mrf.mxu1 }
 0x96e   :  { %v787_v47 = vadd.f32 %v783_v46, %v716_v44 }
 0x96f   :  { %v1336_v48 = vpop.f32.mrf.mxu1 }
 0x970   :  { %v940_v49 = vmul.f32 -1.442695, %v787_v47 }
 0x972   :  { %1425 = vpow2.f32 %v940_v49 }
 0x973   :  { %1427 = vtanh.f32 %v787_v47 }
 0x97f   :  { %v1426_v50 = vpop.eup %1425 }
 0x980   :  { %v792_v51 = vadd.f32 1.0, %v1426_v50  ;;  %v1428_v52 = vpop.eup %1427 }
 0x982   :  { %1429 = vrcp.f32 %v792_v51 }
 0x98f   :  { %v1430_v53 = vpop.eup %1429 }
 0x990   :  { %v795_v54 = vsel %vm1693_vm4, %v1428_v52, %v1430_v53 }
 0x991   :  { %798 = vrot.lane.b32.xlu1 %v795_v54, %s1445_s23  ;;  %796 = vrot.lane.b32.xlu0 %v795_v54, %s1444_s22  ;;  %v802_v57 = vmul.f32 %v795_v54, %v710_v19 }
 0x995   :  { %800 = vrot.lane.b32.xlu0 %v795_v54, %s1443_s5 }
 0xa03   :  { %v799_v55 = vpop.permute.xlu1 %798  ;;  %v797_v56 = vpop.permute.xlu0 %796 }
 0xa04   :  { %v803_v58 = vmul.f32 %v799_v55, %v797_v56 }
 0xa06   :  { %v804_v59 = vadd.f32 %v803_v58, %v802_v57 }
 0xa07   :  { %v801_v62 = vpop.permute.xlu0 %800 }
 0xa08   :  { %v805_v60 = vsel %vm1705_vm7, %v804_v59, 0.0 }
 0xa09   :  { %1431 = vtanh.f32 %v805_v60 }
 0xa16   :  { %v1432_v61 = vpop.eup %1431 }
 0xa17   :  { %v807_v63 = vmul.f32 %v1432_v61, %v801_v62 }
 0xa19   :  { %v808_v4 = vsel %vm1705_vm7, %v807_v63, 0.0  ;;  %1370 = vmatmul.mubr.msk.f32.vlgmr.msra.gmra.mxu0 %vm1705_vm7, %v807_v63 }
 0xa1a   :  { %941 = vst [vmem:[%s1994_s6 + $0xc] sm:$0x3] %v808_v4 }
 0xad9   :  { %v878_v7 = vpop.f32.mrf.mxu0 }
 0xada   :  { %v882_v8 = vadd.f32 %v878_v7, %v811_v5 }
 0xadb   :  { %v1371_v21 = vpop.f32.mrf.mxu0 }
 0xadc   :  { %v943_v22 = vmul.f32 -1.442695, %v882_v8 }
 0xade   :  { %1433 = vpow2.f32 %v943_v22 }
 0xadf   :  { %1435 = vtanh.f32 %v882_v8 }
 0xaeb   :  { %v1434_v23 = vpop.eup %1433 }
 0xaec   :  { %v887_v24 = vadd.f32 1.0, %v1434_v23  ;;  %v1436_v25 = vpop.eup %1435 }
 0xaee   :  { %1437 = vrcp.f32 %v887_v24 }
 0xafb   :  { %v1438_v26 = vpop.eup %1437 }
 0xafc   :  { %v890_v27 = vsel %vm1693_vm4, %v1436_v25, %v1438_v26 }
 0xafd   :  { %893 = vrot.lane.b32.xlu0 %v890_v27, %s1445_s23  ;;  %891 = vrot.lane.b32.xlu1 %v890_v27, %s1444_s22  ;;  %v897_v30 = vmul.f32 %v890_v27, %v805_v60 }
 0xb01   :  { %895 = vrot.lane.b32.xlu1 %v890_v27, %s1443_s5 }
 0xb6f   :  { %v894_v28 = vpop.permute.xlu0 %893  ;;  %v892_v29 = vpop.permute.xlu1 %891 }
 0xb70   :  { %v898_v31 = vmul.f32 %v894_v28, %v892_v29 }
 0xb72   :  { %v899_v32 = vadd.f32 %v898_v31, %v897_v30 }
 0xb73   :  { %v896_v34 = vpop.permute.xlu1 %895 }
 0xb74   :  { %v900_v33 = vsel %vm1705_vm7, %v899_v32, 0.0 }
 0xb75   :  { %1439 = vtanh.f32 %v900_v33  ;;  %907 = vst [vmem:[%s1995_s8] sm:$0x3] %v900_v33 }
 0xb82   :  { %v1440_v36 = vpop.eup %1439 }
 0xb83   :  { %v902_v35 = vmul.f32 %v1440_v36, %v896_v34 }
 0xb85   :  { %v903_v37 = vsel %vm1705_vm7, %v902_v35, 0.0 }
 0xb86   :  { %944 = vst [vmem:[%s1994_s6 + $0xe] sm:$0x3] %v903_v37  ;;  %906 = vst [vmem:[%s1996_s7] sm:$0x3] %v903_v37 }

</bundles_post_ra>
